<compile_context>
chip_gen: v7x
topology: tpu7x:2x2x1
jax: 0.10.0
libtpu: 0.0.40
codegen_flags: <defaults>
</compile_context>

<pallas_src>
import functools

import jax
import jax.numpy as jnp
from jax.experimental import pallas as pl
from jax.experimental.pallas import tpu as pltpu


def _round_up(x, m):
    return (x + m - 1) // m * m


# ----------------------------- Pallas kernel --------------------------------
def _gcn_fused_kernel(*refs, layer_cfg):
    """Fused GCN stack: H_{l+1} = act(A_hat @ H_l @ W_l + b_l), all layers in one kernel.

    refs = (a_ref, x_ref, w_0, b_0, ..., w_{L-1}, b_{L-1}, o_ref, h_scratch).
    A_hat / H / W are bf16 MXU operands; accumulation + bias/ReLU epilogue in f32.
    layer_cfg: static tuple of (apply_relu, ax_first, fi_pad, fo_pad) per layer.
    The inter-layer H is staged through the bf16 VMEM scratch to bound vreg live ranges
    across the unrolled layers (otherwise the 3-layer body sits at the 64-vreg limit).
    """
    n_layers = len(layer_cfg)
    a_ref, x_ref = refs[0], refs[1]
    o_ref = refs[2 + 2 * n_layers]
    h_scr = refs[3 + 2 * n_layers]

    for li, (apply_relu, ax_first, fi_p, fo_p) in enumerate(layer_cfg):
        # Read every operand at its point of use (bounds live ranges per layer).
        a = a_ref[...]                                   # bf16 [Np, Np]
        h = x_ref[...] if li == 0 else h_scr[:, :fi_p]   # bf16 [Np, fi_p]
        w = refs[2 + 2 * li][...]                        # bf16 [fi_p, fo_p]
        b = refs[3 + 2 * li][...]                        # f32  [1, fo_p]
        if ax_first:
            # (A @ H) @ W  -- cheaper when F_out >= F_in
            ah = jnp.dot(a, h, preferred_element_type=jnp.float32)
            y = jnp.dot(ah.astype(jnp.bfloat16), w, preferred_element_type=jnp.float32)
        else:
            # A @ (H @ W)  -- cheaper when F_out < F_in (final layer)
            hw = jnp.dot(h, w, preferred_element_type=jnp.float32)
            y = jnp.dot(a, hw.astype(jnp.bfloat16), preferred_element_type=jnp.float32)
        y = y + b                          # f32 bias add (VPU)
        if apply_relu:
            y = jnp.maximum(y, 0.0)        # f32 ReLU
        if li < n_layers - 1:
            h_scr[:, :fo_p] = y.astype(jnp.bfloat16)     # stage H in VMEM, not vregs
        else:
            o_ref[...] = y.astype(o_ref.dtype)           # lane-dense padded store


# ----------------------------- GCN forward ----------------------------------
def make_gcn_forward(a_hat, features_shape, params):
    """One-time prep + a jitted forward.

    Pads A_hat / weights / biases to lane-dense (multiples of 128) shapes, casts MXU
    operands to bf16, builds the fused pallas_call, and returns a jitted
    forward(features) that only has to pad the features per call.
    """
    n = a_hat.shape[0]
    f_in = features_shape[1]
    n_classes = params[-1][0].shape[1]
    n_layers = len(params)

    n_pad = _round_up(n, 128)
    f_in_pad = _round_up(f_in, 128)
    f_out_pad_last = _round_up(n_classes, 128)

    # --- one-time operand prep (cached, captured by the jitted closure) ---
    a_p = jnp.pad(a_hat, ((0, n_pad - n), (0, n_pad - n))).astype(jnp.bfloat16)

    weight_operands = []
    layer_cfg = []
    flops = 0
    for li, (w, b) in enumerate(params):
        fi, fo = w.shape
        fi_p, fo_p = _round_up(fi, 128), _round_up(fo, 128)
        w_p = jnp.pad(w, ((0, fi_p - fi), (0, fo_p - fo))).astype(jnp.bfloat16)
        b_p = jnp.pad(b, ((0, 0), (0, fo_p - fo))).astype(jnp.float32)
        weight_operands += [w_p, b_p]
        ax_first = fo >= fi
        layer_cfg.append((li != n_layers - 1, ax_first, fi_p, fo_p))
        if ax_first:
            flops += 2 * n_pad * n_pad * fi_p + 2 * n_pad * fi_p * fo_p
        else:
            flops += 2 * n_pad * fi_p * fo_p + 2 * n_pad * n_pad * fo_p

    # Inter-layer H scratch (bf16).  All hidden dims pad to <=128 at this size;
    # take the max to stay correct for other configs.
    max_h_pad = max([cfg[3] for cfg in layer_cfg[:-1]] + [128])

    operand_bytes = (
        a_p.size * 2 + n_pad * f_in_pad * 2
        + sum(int(op.size) * op.dtype.itemsize for op in weight_operands)
        + n_pad * f_out_pad_last * 4
    )

    kernel = functools.partial(_gcn_fused_kernel, layer_cfg=tuple(layer_cfg))
    # Monolithic, no grid: everything fits in a few hundred KiB of VMEM at this size.
    # NOTE(scaling): for large graphs switch to a row/K-tiled grid ("parallel" node-row
    # axis for v7x's 2 TCs, 256-wide tiles on v6e/v7x, 128 on v5e) -- not worth the
    # per-step overhead at N_pad=128.
    call = pl.pallas_call(
        kernel,
        out_shape=jax.ShapeDtypeStruct((n_pad, f_out_pad_last), jnp.float32),
        in_specs=[pl.BlockSpec(memory_space=pltpu.MemorySpace.VMEM)]
        * (2 + len(weight_operands)),
        out_specs=pl.BlockSpec(memory_space=pltpu.MemorySpace.VMEM),
        scratch_shapes=[pltpu.VMEM((n_pad, max_h_pad), jnp.bfloat16)],
        compiler_params=pltpu.CompilerParams(vmem_limit_bytes=32 * 1024 * 1024),
        cost_estimate=pl.CostEstimate(
            flops=int(flops), transcendentals=0, bytes_accessed=int(operand_bytes)
        ),
    )

    @jax.jit
    def forward(features):
        # Single fused pad (no full-size zero temp + dynamic-update-slice).
        x_p = jnp.pad(
            features, ((0, n_pad - n), (0, f_in_pad - f_in))
        ).astype(jnp.bfloat16)
        out_p = call(a_p, x_p, *weight_operands)
        return out_p[:n, :n_classes]

    return forward


# ---------------------------- pure-JAX reference -----------------------------
def gcn_reference(a_hat, features, params):
    """Mirrors the kernel's numerics (bf16 MXU operands, f32 accumulation, same association)."""
    a = a_hat.astype(jnp.bfloat16)
    h = features.astype(jnp.bfloat16)
    n_layers = len(params)
    for li, (w, b) in enumerate(params):
        wb = w.astype(jnp.bfloat16)
        if w.shape[1] >= w.shape[0]:
            ah = jnp.dot(a, h, preferred_element_type=jnp.float32)
            y = jnp.dot(ah.astype(jnp.bfloat16), wb, preferred_element_type=jnp.float32)
        else:
            hw = jnp.dot(h, wb, preferred_element_type=jnp.float32)
            y = jnp.dot(a, hw.astype(jnp.bfloat16), preferred_element_type=jnp.float32)
        y = y + b
        if li != n_layers - 1:
            y = jnp.maximum(y, 0.0)
            h = y.astype(jnp.bfloat16)
        else:
            return y
    return h


# --------------------------- deterministic setup -----------------------------
def build_graph_and_params(key, n_nodes, in_feats, n_hidden, n_classes, n_layers):
    keys = jax.random.split(key, 2 + n_layers + 1)
    k_adj, k_feat, k_ws = keys[0], keys[1], keys[2:]

    # Random symmetric graph with self-loops (avoids zero degrees / inf norms).
    logits = jax.random.uniform(k_adj, (n_nodes, n_nodes))
    adj = (logits < 0.1).astype(jnp.float32)
    adj = jnp.maximum(adj, adj.T)                      # symmetric
    adj = jnp.maximum(adj, jnp.eye(n_nodes))           # self-loops

    deg_out = adj.sum(axis=0)                          # out-degree of src u
    deg_in = adj.sum(axis=1)                           # in-degree of dst v
    a_hat = (1.0 / jnp.sqrt(deg_in))[:, None] * adj * (1.0 / jnp.sqrt(deg_out))[None, :]

    features = jax.random.normal(k_feat, (n_nodes, in_feats), dtype=jnp.float32)

    # Layer sizes: in->hidden, (n_layers-1) x hidden->hidden, hidden->classes.
    dims = [in_feats] + [n_hidden] * n_layers + [n_classes]
    params = []
    for li, (f_in, f_out) in enumerate(zip(dims[:-1], dims[1:])):
        scale = jnp.sqrt(2.0 / (f_in + f_out)).astype(jnp.float32)  # xavier-ish
        w = scale * jax.random.normal(k_ws[li], (f_in, f_out), dtype=jnp.float32)
        b = jnp.zeros((1, f_out), dtype=jnp.float32)
        params.append((w, b))
    return a_hat.astype(jnp.float32), features, params


if __name__ == "__main__":
    key = jax.random.PRNGKey(0)

    # Small shapes implied by the module: 64-node graph, in_feats=16,
    # n_hidden=32, n_classes=8, n_layers=2 (=> 3 GraphConv layers), ReLU act.
    N_NODES, IN_FEATS, N_HIDDEN, N_CLASSES, N_LAYERS = 64, 16, 32, 8, 2

    a_hat, features, params = build_graph_and_params(
        key, N_NODES, IN_FEATS, N_HIDDEN, N_CLASSES, N_LAYERS
    )

    forward = make_gcn_forward(a_hat, features.shape, params)

    out = forward(features)
    out = jax.block_until_ready(out)
    assert out.shape == (N_NODES, N_CLASSES), out.shape

    ref = gcn_reference(a_hat, features, params)
    assert jnp.allclose(out, ref, atol=1e-2, rtol=1e-2), float(jnp.max(jnp.abs(out - ref)))

    print("KERNEL_OK")
</pallas_src>

<mosaic_0001>
module attributes {stable_mosaic.version = 11 : i64} {
  func.func @_gcn_fused_kernel(%arg0: memref<128x128xbf16, #tpu.memory_space<vmem>>, %arg1: memref<128x128xbf16, #tpu.memory_space<vmem>>, %arg2: memref<128x128xbf16, #tpu.memory_space<vmem>>, %arg3: memref<1x128xf32, #tpu.memory_space<vmem>>, %arg4: memref<128x128xbf16, #tpu.memory_space<vmem>>, %arg5: memref<1x128xf32, #tpu.memory_space<vmem>>, %arg6: memref<128x128xbf16, #tpu.memory_space<vmem>>, %arg7: memref<1x128xf32, #tpu.memory_space<vmem>>, %arg8: memref<128x128xf32, #tpu.memory_space<vmem>>, %arg9: memref<128x128xbf16, #tpu.memory_space<vmem>>) attributes {dimension_semantics = [], scalar_prefetch = 0 : i64, scratch_operands = 1 : i64, tpu.core_type = #tpu.core_type<tc>} {
    %c0 = arith.constant 0 : index
    %c0_0 = arith.constant 0 : index
    %0 = vector.load %arg0[%c0, %c0_0] : memref<128x128xbf16, #tpu.memory_space<vmem>>, vector<128x128xbf16>
    %c0_1 = arith.constant 0 : index
    %c0_2 = arith.constant 0 : index
    %1 = vector.load %arg1[%c0_1, %c0_2] : memref<128x128xbf16, #tpu.memory_space<vmem>>, vector<128x128xbf16>
    %c0_3 = arith.constant 0 : index
    %c0_4 = arith.constant 0 : index
    %2 = vector.load %arg2[%c0_3, %c0_4] : memref<128x128xbf16, #tpu.memory_space<vmem>>, vector<128x128xbf16>
    %c0_5 = arith.constant 0 : index
    %c0_6 = arith.constant 0 : index
    %3 = vector.load %arg3[%c0_5, %c0_6] : memref<1x128xf32, #tpu.memory_space<vmem>>, vector<1x128xf32>
    %cst = arith.constant dense<0.000000e+00> : vector<128x128xf32>
    %4 = tpu.matmul %0, %1, %cst {dimension_numbers = #tpu.dot_dimension_numbers<[1], [0], [0], [1], [0, 0, 1, 1], [], []>} : vector<128x128xbf16>, vector<128x128xbf16>, vector<128x128xf32> -> vector<128x128xf32>
    %5 = arith.truncf %4 : vector<128x128xf32> to vector<128x128xbf16>
    %cst_7 = arith.constant dense<0.000000e+00> : vector<128x128xf32>
    %6 = tpu.matmul %5, %2, %cst_7 {dimension_numbers = #tpu.dot_dimension_numbers<[1], [0], [0], [1], [0, 0, 1, 1], [], []>} : vector<128x128xbf16>, vector<128x128xbf16>, vector<128x128xf32> -> vector<128x128xf32>
    %7 = vector.broadcast %3 : vector<1x128xf32> to vector<128x128xf32>
    %8 = arith.addf %6, %7 : vector<128x128xf32>
    %cst_8 = arith.constant 0.000000e+00 : f32
    %9 = vector.broadcast %cst_8 : f32 to vector<128x128xf32>
    %10 = arith.maximumf %8, %9 : vector<128x128xf32>
    %11 = arith.truncf %10 : vector<128x128xf32> to vector<128x128xbf16>
    %c0_9 = arith.constant 0 : index
    %c0_10 = arith.constant 0 : index
    %12 = vector.load %arg9[%c0_9, %c0_10] : memref<128x128xbf16, #tpu.memory_space<vmem>>, vector<128x128xbf16>
    tpu.vector_store %arg9[%c0_9, %c0_10], %11 {strides = array<i32>} : memref<128x128xbf16, #tpu.memory_space<vmem>>, vector<128x128xbf16>,
    %c0_11 = arith.constant 0 : index
    %c0_12 = arith.constant 0 : index
    %13 = vector.load %arg0[%c0_11, %c0_12] : memref<128x128xbf16, #tpu.memory_space<vmem>>, vector<128x128xbf16>
    %c0_13 = arith.constant 0 : index
    %c0_14 = arith.constant 0 : index
    %14 = vector.load %arg9[%c0_13, %c0_14] : memref<128x128xbf16, #tpu.memory_space<vmem>>, vector<128x128xbf16>
    %c0_15 = arith.constant 0 : index
    %c0_16 = arith.constant 0 : index
    %15 = vector.load %arg4[%c0_15, %c0_16] : memref<128x128xbf16, #tpu.memory_space<vmem>>, vector<128x128xbf16>
    %c0_17 = arith.constant 0 : index
    %c0_18 = arith.constant 0 : index
    %16 = vector.load %arg5[%c0_17, %c0_18] : memref<1x128xf32, #tpu.memory_space<vmem>>, vector<1x128xf32>
    %cst_19 = arith.constant dense<0.000000e+00> : vector<128x128xf32>
    %17 = tpu.matmul %13, %14, %cst_19 {dimension_numbers = #tpu.dot_dimension_numbers<[1], [0], [0], [1], [0, 0, 1, 1], [], []>} : vector<128x128xbf16>, vector<128x128xbf16>, vector<128x128xf32> -> vector<128x128xf32>
    %18 = arith.truncf %17 : vector<128x128xf32> to vector<128x128xbf16>
    %cst_20 = arith.constant dense<0.000000e+00> : vector<128x128xf32>
    %19 = tpu.matmul %18, %15, %cst_20 {dimension_numbers = #tpu.dot_dimension_numbers<[1], [0], [0], [1], [0, 0, 1, 1], [], []>} : vector<128x128xbf16>, vector<128x128xbf16>, vector<128x128xf32> -> vector<128x128xf32>
    %20 = vector.broadcast %16 : vector<1x128xf32> to vector<128x128xf32>
    %21 = arith.addf %19, %20 : vector<128x128xf32>
    %cst_21 = arith.constant 0.000000e+00 : f32
    %22 = vector.broadcast %cst_21 : f32 to vector<128x128xf32>
    %23 = arith.maximumf %21, %22 : vector<128x128xf32>
    %24 = arith.truncf %23 : vector<128x128xf32> to vector<128x128xbf16>
    %c0_22 = arith.constant 0 : index
    %c0_23 = arith.constant 0 : index
    %25 = vector.load %arg9[%c0_22, %c0_23] : memref<128x128xbf16, #tpu.memory_space<vmem>>, vector<128x128xbf16>
    tpu.vector_store %arg9[%c0_22, %c0_23], %24 {strides = array<i32>} : memref<128x128xbf16, #tpu.memory_space<vmem>>, vector<128x128xbf16>,
    %c0_24 = arith.constant 0 : index
    %c0_25 = arith.constant 0 : index
    %26 = vector.load %arg0[%c0_24, %c0_25] : memref<128x128xbf16, #tpu.memory_space<vmem>>, vector<128x128xbf16>
    %c0_26 = arith.constant 0 : index
    %c0_27 = arith.constant 0 : index
    %27 = vector.load %arg9[%c0_26, %c0_27] : memref<128x128xbf16, #tpu.memory_space<vmem>>, vector<128x128xbf16>
    %c0_28 = arith.constant 0 : index
    %c0_29 = arith.constant 0 : index
    %28 = vector.load %arg6[%c0_28, %c0_29] : memref<128x128xbf16, #tpu.memory_space<vmem>>, vector<128x128xbf16>
    %c0_30 = arith.constant 0 : index
    %c0_31 = arith.constant 0 : index
    %29 = vector.load %arg7[%c0_30, %c0_31] : memref<1x128xf32, #tpu.memory_space<vmem>>, vector<1x128xf32>
    %cst_32 = arith.constant dense<0.000000e+00> : vector<128x128xf32>
    %30 = tpu.matmul %27, %28, %cst_32 {dimension_numbers = #tpu.dot_dimension_numbers<[1], [0], [0], [1], [0, 0, 1, 1], [], []>} : vector<128x128xbf16>, vector<128x128xbf16>, vector<128x128xf32> -> vector<128x128xf32>
    %31 = arith.truncf %30 : vector<128x128xf32> to vector<128x128xbf16>
    %cst_33 = arith.constant dense<0.000000e+00> : vector<128x128xf32>
    %32 = tpu.matmul %26, %31, %cst_33 {dimension_numbers = #tpu.dot_dimension_numbers<[1], [0], [0], [1], [0, 0, 1, 1], [], []>} : vector<128x128xbf16>, vector<128x128xbf16>, vector<128x128xf32> -> vector<128x128xf32>
    %33 = vector.broadcast %29 : vector<1x128xf32> to vector<128x128xf32>
    %34 = arith.addf %32, %33 : vector<128x128xf32>
    %c0_34 = arith.constant 0 : index
    %c0_35 = arith.constant 0 : index
    %35 = vector.load %arg8[%c0_34, %c0_35] : memref<128x128xf32, #tpu.memory_space<vmem>>, vector<128x128xf32>
    tpu.vector_store %arg8[%c0_34, %c0_35], %34 {strides = array<i32>} : memref<128x128xf32, #tpu.memory_space<vmem>>, vector<128x128xf32>,
    return
  }
}

</mosaic_0001>

<bundles_post_ra>
// kernel: forward.1
= control target key start
LH: loop header
LB: loop body
LE: loop exit
PB: predicated region body
PF: predicated region fallthrough
CT: control target
= control target key end

     0   :  { %13 = vsyncpa [#allocation4], 0  ;;  %s1650_s27 = smov [#allocation3]   ;;  %s1863_s0 = inlined_call_operand.hbm [shape: bf16[128,128], index: 0, kind: input, shape index: {}]   ;;  %s1864_s1 = inlined_call_operand.vmem [shape: bf16[128,128], index: 1, kind: input, shape index: {}]   ;;  %s1865_s2 = inlined_call_operand.vmem [shape: bf16[128,128], index: 2, kind: input, shape index: {}]   ;;  %s1866_s3 = inlined_call_operand.vmem [shape: f32[1,128], index: 3, kind: input, shape index: {}, may-alias: {3,5,7}]   ;;  %s1867_s4 = inlined_call_operand.vmem [shape: bf16[128,128], index: 4, kind: input, shape index: {}]   ;;  %s1868_s5 = inlined_call_operand.vmem [shape: f32[1,128], index: 5, kind: input, shape index: {}, may-alias: {3,5,7}]   ;;  %s1869_s6 = inlined_call_operand.vmem [shape: bf16[128,128], index: 6, kind: input, shape index: {}]   ;;  %s1870_s7 = inlined_call_operand.vmem [shape: f32[1,128], index: 7, kind: input, shape index: {}, may-alias: {3,5,7}]   ;;  %s1871_s8 = inlined_call_operand.vmem [shape: f32[128,128], index: 8, kind: output, shape index: {}]  }
   0x1   :  { %s19_s28 = sshll.u32 %s1650_s27, 4  ;;  %s1626_s9 = scalar_lea.hbm %s1863_s0, 1024  ;;  %s20_s28 = int_to_ptr.vmem [resolvable:$true] %s19_s28 }
   0x2   :  { %p1627_p0 = scmp.ne.s32.totalorder %s1863_s0, %s1626_s9  ;;  %p1630_p1 = scmp.lt.u32.totalorder %s1626_s9, %s1863_s0 }
   0x4   :  { %p1632_p2 = pnand %p1630_p1, %p1627_p0 }
   0x6   :  { %1635 = shalt.err (!%p1632_p2)
}
   0x7   :  { %s1636_s14 = scalar_lea.vmem %s20_s28, 1024  ;;  %p1641_p4 = scmp.lt.s32.totalorder %s20_s28, %s20_s28 }
   0x8   :  { %p1637_p3 = scmp.ne.s32.totalorder %s20_s28, %s1636_s14  ;;  %p1642_p5 = scmp.lt.s32.totalorder %s1636_s14, %s1636_s14 }
   0xa   :  { %p1643_p6 = por %p1642_p5, %p1641_p4 }
   0xc   :  { %p1644_p7 = pnand %p1643_p6, %p1637_p3 }
   0xe   :  { %1647 = shalt.err (!%p1644_p7)
}
   0xf   :  { %s1651_s15 = smov 64   ;;  %s1652_s16 = smov 4  }
  0x10   :  { %25 = dma.hbm_to_vmem [thread:$0]  %s1863_s0, 1024, %s20_s28, [#allocation4], %s1651_s15, %s1651_s15, %s1652_s16  }
  0x11   :  { %1648 = dma.done.wait [#allocation4], 1024  }
  0x12   :  { %1649 = vsyncadd [#allocation4], 4294966272  ;;  %v1570_v0 = vld [vmem:[%s1864_s1] sm:$0xff]   ;;  %v1571_v1 = vld [vmem:[%s1864_s1 + $0x8] sm:$0xff]  }
  0x13   :  { %1375 = vmatprep.subr.bf16.mxu0 %v1570_v0  ;;  %v1572_v2 = vld [vmem:[%s1864_s1 + $0x10] sm:$0xff]   ;;  %v1573_v3 = vld [vmem:[%s1864_s1 + $0x18] sm:$0xff]   ;;  %v1578_v4 = vld [vmem:[#allocation3] sm:$0xff]  }
  0x14   :  { %1376 = vmatpush3.bf16.msra.mxu0 %v1570_v0  ;;  %1391 = vmatprep.mubr.bf16.mxu0 %v1578_v4  ;;  %v1574_v5 = vld [vmem:[%s1864_s1 + $0x20] sm:$0xff]   ;;  %v1575_v6 = vld [vmem:[%s1864_s1 + $0x28] sm:$0xff]   ;;  %v1576_v9 = vld [vmem:[%s1864_s1 + $0x30] sm:$0xff]  }
  0x15   :  { %1377 = vmatprep.subr.bf16.mxu0 %v1571_v1  ;;  %v1586_v7 = vld [vmem:[%s1865_s2] sm:$0xff]   ;;  %v1587_v8 = vld [vmem:[%s1865_s2 + $0x8] sm:$0xff]   ;;  %v1588_v10 = vld [vmem:[%s1865_s2 + $0x10] sm:$0xff]  }
  0x16   :  { %1407 = vmatprep.subr.bf16.mxu1 %v1586_v7  ;;  %v1577_v11 = vld [vmem:[%s1864_s1 + $0x38] sm:$0xff]   ;;  %v1590_v13 = vld [vmem:[%s1865_s2 + $0x20] sm:$0xff]   ;;  %v1579_v14 = vld [vmem:[#allocation3 + $0x8] sm:$0xff]  }
  0x17   :  { %1408 = vmatpush3.bf16.msra.mxu1 %v1586_v7  ;;  %v1589_v12 = vld [vmem:[%s1865_s2 + $0x18] sm:$0xff]   ;;  %v1580_v15 = vld [vmem:[#allocation3 + $0x10] sm:$0xff]   ;;  %v1591_v16 = vld [vmem:[%s1865_s2 + $0x28] sm:$0xff]  }
  0x18   :  { %1378 = vmatpush3.bf16.msra.mxu0 %v1571_v1  ;;  %1409 = vmatprep.subr.bf16.mxu1 %v1587_v8  ;;  %v1592_v17 = vld [vmem:[%s1865_s2 + $0x30] sm:$0xff]   ;;  %v1581_v18 = vld [vmem:[#allocation3 + $0x18] sm:$0xff]   ;;  %v1582_v19 = vld [vmem:[#allocation3 + $0x20] sm:$0xff]  }
  0x19   :  { %1379 = vmatprep.subr.bf16.mxu0 %v1572_v2  ;;  %v1583_v20 = vld [vmem:[#allocation3 + $0x28] sm:$0xff]   ;;  %v1584_v21 = vld [vmem:[#allocation3 + $0x30] sm:$0xff]   ;;  %v1585_v22 = vld [vmem:[#allocation3 + $0x38] sm:$0xff]  }
  0x1a   :  { %v1593_v23 = vld [vmem:[%s1865_s2 + $0x38] sm:$0xff]   ;;  %v1594_v48 = vld [vmem:[#allocation3] sm:$0xff]   ;;  %v1603_v50 = vld [vmem:[%s1867_s4 + $0x8] sm:$0xff]  }
  0x1b   :  { %1410 = vmatpush3.bf16.msra.mxu1 %v1587_v8  ;;  %v1602_v49 = vld [vmem:[%s1867_s4] sm:$0xff]   ;;  %v1604_v51 = vld [vmem:[%s1867_s4 + $0x10] sm:$0xff]   ;;  %v1605_v52 = vld [vmem:[%s1867_s4 + $0x18] sm:$0xff]  }
  0x1c   :  { %1380 = vmatpush3.bf16.msra.mxu0 %v1572_v2  ;;  %1411 = vmatprep.subr.bf16.mxu1 %v1588_v10  ;;  %v1606_v53 = vld [vmem:[%s1867_s4 + $0x20] sm:$0xff]   ;;  %v1607_v54 = vld [vmem:[%s1867_s4 + $0x28] sm:$0xff]   ;;  %v1608_v55 = vld [vmem:[%s1867_s4 + $0x30] sm:$0xff]  }
  0x1d   :  { %1381 = vmatprep.subr.bf16.mxu0 %v1573_v3  ;;  %v1236_v56 = vld [vmem:[%s1866_s3] ss:$0 sm:$0xff] }
  0x1f   :  { %1412 = vmatpush3.bf16.msra.mxu1 %v1588_v10 }
  0x20   :  { %1382 = vmatpush3.bf16.msra.mxu0 %v1573_v3  ;;  %1413 = vmatprep.subr.bf16.mxu1 %v1589_v12 }
  0x21   :  { %1383 = vmatprep.subr.bf16.mxu0 %v1574_v5 }
  0x23   :  { %1414 = vmatpush3.bf16.msra.mxu1 %v1589_v12 }
  0x24   :  { %1384 = vmatpush3.bf16.msra.mxu0 %v1574_v5  ;;  %1415 = vmatprep.subr.bf16.mxu1 %v1590_v13 }
  0x25   :  { %1385 = vmatprep.subr.bf16.mxu0 %v1575_v6 }
  0x27   :  { %1416 = vmatpush3.bf16.msra.mxu1 %v1590_v13 }
  0x28   :  { %1386 = vmatpush3.bf16.msra.mxu0 %v1575_v6  ;;  %1417 = vmatprep.subr.bf16.mxu1 %v1591_v16 }
  0x29   :  { %1387 = vmatprep.subr.bf16.mxu0 %v1576_v9 }
  0x2b   :  { %1418 = vmatpush3.bf16.msra.mxu1 %v1591_v16 }
  0x2c   :  { %1388 = vmatpush3.bf16.msra.mxu0 %v1576_v9  ;;  %1419 = vmatprep.subr.bf16.mxu1 %v1592_v17 }
  0x2d   :  { %1389 = vmatprep.subr.bf16.mxu0 %v1577_v11 }
  0x2f   :  { %1420 = vmatpush3.bf16.msra.mxu1 %v1592_v17 }
  0x30   :  { %1390 = vmatpush3.bf16.msra.mxu0 %v1577_v11  ;;  %1421 = vmatprep.subr.bf16.mxu1 %v1593_v23 }
  0x33   :  { %1392 = vmatmul.mubr.bf16.vlgmr.msra.gmra.mrb[0].mxu0 %v1579_v14  ;;  %1422 = vmatpush3.bf16.msra.mxu1 %v1593_v23 }
  0x34   :  { %1395 = vmatprep.mubr.bf16.mxu0 %v1580_v15  ;;  %1471 = vmatprep.subr.bf16.mxu1 %v1602_v49 }
  0x3b   :  { %1396 = vmatmul.mubr.bf16.gmra.mrb[4].mxu0 %v1581_v18 }
  0x3c   :  { %1399 = vmatprep.mubr.bf16.mxu0 %v1582_v19 }
  0x43   :  { %1400 = vmatmul.mubr.bf16.gmra.mrb[8].mxu0 %v1583_v20 }
  0x44   :  { %1403 = vmatprep.mubr.bf16.mxu0 %v1584_v21 }
  0x4b   :  { %1404 = vmatmul.mubr.bf16.gmra.mrb[12].mxu0 %v1585_v22 }
  0x4c   :  { %1455 = vmatprep.mubr.bf16.mxu0 %v1594_v48 }
 0x106   :  { %v1393_v24 = vpop.f32.mrb[0].mxu0 }
 0x107   :  { %v223_v25 = vpop.f32.mrb[1].mxu0 }
 0x108   :  { %v1394_v26 = vpop.f32.mrb[2].mxu0 }
 0x109   :  { %v287_v27 = vpack.c.bf16 %v1394_v26, %v1393_v24  ;;  %v226_v28 = vpop.f32.mrb[3].mxu0 }
 0x10a   :  { %v286_v29 = vpack.c.bf16 %v226_v28, %v223_v25 }
 0x10c   :  { %1423 = vmatprep.mubr.bf16.mxu1 %v286_v29 }
 0x10d   :  { %1424 = vmatmul.mubr.bf16.vlgmr.msra.gmra.mrb[0].mxu1 %v287_v27 }
 0x10e   :  { %v1397_v30 = vpop.f32.mrb[4].mxu0  ;;  %1472 = vmatpush3.bf16.msra.mxu1 %v1602_v49  ;;  %v1595_v49 = vld [vmem:[#allocation3 + $0x8] sm:$0xff]  }
 0x10f   :  { %v239_v31 = vpop.f32.mrb[5].mxu0  ;;  %1473 = vmatprep.subr.bf16.mxu1 %v1603_v50 }
 0x110   :  { %v1398_v32 = vpop.f32.mrb[6].mxu0 }
 0x111   :  { %v289_v33 = vpack.c.bf16 %v1398_v32, %v1397_v30  ;;  %v242_v34 = vpop.f32.mrb[7].mxu0 }
 0x112   :  { %v288_v35 = vpack.c.bf16 %v242_v34, %v239_v31  ;;  %1474 = vmatpush3.bf16.msra.mxu1 %v1603_v50  ;;  %v1596_v50 = vld [vmem:[#allocation3 + $0x10] sm:$0xff]  }
 0x113   :  { %1475 = vmatprep.subr.bf16.mxu1 %v1604_v51 }
 0x114   :  { %1427 = vmatprep.mubr.bf16.mxu1 %v288_v35 }
 0x115   :  { %1428 = vmatmul.mubr.bf16.gmra.mrb[4].mxu1 %v289_v33 }
 0x116   :  { %v1401_v36 = vpop.f32.mrb[8].mxu0  ;;  %1476 = vmatpush3.bf16.msra.mxu1 %v1604_v51  ;;  %v1597_v51 = vld [vmem:[#allocation3 + $0x18] sm:$0xff]  }
 0x117   :  { %v255_v37 = vpop.f32.mrb[9].mxu0  ;;  %1477 = vmatprep.subr.bf16.mxu1 %v1605_v52 }
 0x118   :  { %v1402_v38 = vpop.f32.mrb[10].mxu0 }
 0x119   :  { %v291_v39 = vpack.c.bf16 %v1402_v38, %v1401_v36  ;;  %v258_v40 = vpop.f32.mrb[11].mxu0 }
 0x11a   :  { %v290_v41 = vpack.c.bf16 %v258_v40, %v255_v37  ;;  %1478 = vmatpush3.bf16.msra.mxu1 %v1605_v52  ;;  %v1598_v52 = vld [vmem:[#allocation3 + $0x20] sm:$0xff]  }
 0x11b   :  { %1479 = vmatprep.subr.bf16.mxu1 %v1606_v53 }
 0x11c   :  { %1431 = vmatprep.mubr.bf16.mxu1 %v290_v41 }
 0x11d   :  { %1432 = vmatmul.mubr.bf16.gmra.mrb[8].mxu1 %v291_v39 }
 0x11e   :  { %v1405_v42 = vpop.f32.mrb[12].mxu0  ;;  %1480 = vmatpush3.bf16.msra.mxu1 %v1606_v53  ;;  %v1599_v53 = vld [vmem:[#allocation3 + $0x28] sm:$0xff]  }
 0x11f   :  { %v271_v43 = vpop.f32.mrb[13].mxu0  ;;  %1481 = vmatprep.subr.bf16.mxu1 %v1607_v54 }
 0x120   :  { %v1406_v44 = vpop.f32.mrb[14].mxu0 }
 0x121   :  { %v293_v45 = vpack.c.bf16 %v1406_v44, %v1405_v42  ;;  %v274_v46 = vpop.f32.mrb[15].mxu0 }
 0x122   :  { %v292_v47 = vpack.c.bf16 %v274_v46, %v271_v43  ;;  %1482 = vmatpush3.bf16.msra.mxu1 %v1607_v54  ;;  %v1600_v54 = vld [vmem:[#allocation3 + $0x30] sm:$0xff]  }
 0x123   :  { %1483 = vmatprep.subr.bf16.mxu1 %v1608_v55 }
 0x124   :  { %1435 = vmatprep.mubr.bf16.mxu1 %v292_v47 }
 0x125   :  { %1436 = vmatmul.mubr.bf16.gmra.mrb[12].mxu1 %v293_v45 }
 0x126   :  { %1484 = vmatpush3.bf16.msra.mxu1 %v1608_v55  ;;  %v1601_v55 = vld [vmem:[#allocation3 + $0x38] sm:$0xff]  }
 0x1e0   :  { %v1425_v57 = vpop.f32.mrb[0].mxu1 }
 0x1e1   :  { %v391_v58 = vadd.f32 %v1425_v57, %v1236_v56  ;;  %v382_v59 = vpop.f32.mrb[1].mxu1  ;;  %v1610_v57 = vld [vmem:[%s1869_s6] sm:$0xff]  }
 0x1e2   :  { %v383_v60 = vadd.f32 %v1236_v56, %v382_v59  ;;  %v1426_v61 = vpop.f32.mrb[2].mxu1  ;;  %v1612_v59 = vld [vmem:[%s1869_s6 + $0x10] sm:$0xff]  }
 0x1e3   :  { %v394_v62 = vadd.f32 %v1426_v61, %v1236_v56  ;;  %v385_v63 = vpop.f32.mrb[3].mxu1  ;;  %v447_v1 = vmax.f32 %v391_v58, 0.0  ;;  %v1611_v58 = vld [vmem:[%s1869_s6 + $0x8] sm:$0xff]   ;;  %v1614_v61 = vld [vmem:[%s1869_s6 + $0x20] sm:$0xff]  }
 0x1e4   :  { %v386_v0 = vadd.f32 %v1236_v56, %v385_v63  ;;  %v445_v3 = vmax.f32 %v383_v60, 0.0  ;;  %v1613_v60 = vld [vmem:[%s1869_s6 + $0x18] sm:$0xff]  }
 0x1e5   :  { %v448_v2 = vmax.f32 %v394_v62, 0.0  ;;  %v1615_v62 = vld [vmem:[%s1869_s6 + $0x28] sm:$0xff]  }
 0x1e6   :  { %v446_v4 = vmax.f32 %v386_v0, 0.0 }
 0x1e7   :  { %v462_v5 = vpack.c.bf16 %v448_v2, %v447_v1 }
 0x1e8   :  { %v461_v6 = vpack.c.bf16 %v446_v4, %v445_v3  ;;  %v1429_v7 = vpop.f32.mrb[4].mxu1 }
 0x1e9   :  { %v407_v8 = vadd.f32 %v1429_v7, %v1236_v56  ;;  %v398_v9 = vpop.f32.mrb[5].mxu1 }
 0x1ea   :  { %v399_v10 = vadd.f32 %v1236_v56, %v398_v9  ;;  %v1430_v11 = vpop.f32.mrb[6].mxu1  ;;  %1439 = vmatprep.subr.bf16.mxu0 %v461_v6 }
 0x1eb   :  { %v410_v12 = vadd.f32 %v1430_v11, %v1236_v56  ;;  %v401_v13 = vpop.f32.mrb[7].mxu1  ;;  %1440 = vmatpush3.bf16.msra.mxu0 %v461_v6  ;;  %v451_v15 = vmax.f32 %v407_v8, 0.0 }
 0x1ec   :  { %v402_v14 = vadd.f32 %v1236_v56, %v401_v13  ;;  %1441 = vmatprep.subr.bf16.mxu0 %v462_v5  ;;  %v449_v17 = vmax.f32 %v399_v10, 0.0 }
 0x1ed   :  { %v452_v16 = vmax.f32 %v410_v12, 0.0 }
 0x1ee   :  { %v450_v18 = vmax.f32 %v402_v14, 0.0 }
 0x1ef   :  { %v464_v19 = vpack.c.bf16 %v452_v16, %v451_v15  ;;  %1442 = vmatpush3.bf16.msra.mxu0 %v462_v5 }
 0x1f0   :  { %v463_v20 = vpack.c.bf16 %v450_v18, %v449_v17  ;;  %v1433_v21 = vpop.f32.mrb[8].mxu1 }
 0x1f1   :  { %v423_v22 = vadd.f32 %v1433_v21, %v1236_v56  ;;  %v414_v23 = vpop.f32.mrb[9].mxu1 }
 0x1f2   :  { %v415_v24 = vadd.f32 %v1236_v56, %v414_v23  ;;  %v1434_v25 = vpop.f32.mrb[10].mxu1  ;;  %1443 = vmatprep.subr.bf16.mxu0 %v463_v20  ;;  %v1616_v23 = vld [vmem:[%s1869_s6 + $0x30] sm:$0xff]  }
 0x1f3   :  { %v426_v26 = vadd.f32 %v1434_v25, %v1236_v56  ;;  %v417_v27 = vpop.f32.mrb[11].mxu1  ;;  %1444 = vmatpush3.bf16.msra.mxu0 %v463_v20  ;;  %v455_v29 = vmax.f32 %v423_v22, 0.0  ;;  %v1253_v25 = vld [vmem:[%s1868_s5] ss:$0 sm:$0xff] }
 0x1f4   :  { %v418_v28 = vadd.f32 %v1236_v56, %v417_v27  ;;  %1445 = vmatprep.subr.bf16.mxu0 %v464_v19  ;;  %v453_v31 = vmax.f32 %v415_v24, 0.0  ;;  %v1617_v24 = vld [vmem:[%s1869_s6 + $0x38] sm:$0xff]  }
 0x1f5   :  { %v456_v30 = vmax.f32 %v426_v26, 0.0 }
 0x1f6   :  { %v454_v32 = vmax.f32 %v418_v28, 0.0 }
 0x1f7   :  { %v466_v33 = vpack.c.bf16 %v456_v30, %v455_v29  ;;  %1446 = vmatpush3.bf16.msra.mxu0 %v464_v19 }
 0x1f8   :  { %v465_v34 = vpack.c.bf16 %v454_v32, %v453_v31  ;;  %v1437_v35 = vpop.f32.mrb[12].mxu1 }
 0x1f9   :  { %v439_v36 = vadd.f32 %v1437_v35, %v1236_v56  ;;  %v430_v37 = vpop.f32.mrb[13].mxu1 }
 0x1fa   :  { %v431_v38 = vadd.f32 %v1236_v56, %v430_v37  ;;  %v1438_v39 = vpop.f32.mrb[14].mxu1  ;;  %1447 = vmatprep.subr.bf16.mxu0 %v465_v34 }
 0x1fb   :  { %v442_v40 = vadd.f32 %v1438_v39, %v1236_v56  ;;  %v433_v41 = vpop.f32.mrb[15].mxu1  ;;  %1448 = vmatpush3.bf16.msra.mxu0 %v465_v34  ;;  %v459_v43 = vmax.f32 %v439_v36, 0.0 }
 0x1fc   :  { %v434_v42 = vadd.f32 %v1236_v56, %v433_v41  ;;  %1449 = vmatprep.subr.bf16.mxu0 %v466_v33  ;;  %v457_v45 = vmax.f32 %v431_v38, 0.0  ;;  %v1609_v56 = vld [vmem:[%s1867_s4 + $0x38] sm:$0xff]  }
 0x1fd   :  { %v460_v44 = vmax.f32 %v442_v40, 0.0  ;;  %1485 = vmatprep.subr.bf16.mxu1 %v1609_v56 }
 0x1fe   :  { %v458_v46 = vmax.f32 %v434_v42, 0.0  ;;  %1486 = vmatpush3.bf16.msra.mxu1 %v1609_v56 }
 0x1ff   :  { %v468_v47 = vpack.c.bf16 %v460_v44, %v459_v43  ;;  %1450 = vmatpush3.bf16.msra.mxu0 %v466_v33 }
 0x200   :  { %v467_v48 = vpack.c.bf16 %v458_v46, %v457_v45 }
 0x202   :  { %1451 = vmatprep.subr.bf16.mxu0 %v467_v48 }
 0x203   :  { %1452 = vmatpush3.bf16.msra.mxu0 %v467_v48 }
 0x204   :  { %1453 = vmatprep.subr.bf16.mxu0 %v468_v47 }
 0x207   :  { %1454 = vmatpush3.bf16.msra.mxu0 %v468_v47 }
 0x208   :  { %1503 = vmatprep.subr.bf16.mxu0 %v1610_v57 }
 0x20a   :  { %1456 = vmatmul.mubr.bf16.vlgmr.msra.gmra.mrb[16].mxu0 %v1595_v49 }
 0x20b   :  { %1459 = vmatprep.mubr.bf16.mxu0 %v1596_v50  ;;  %1504 = vmatpush3.bf16.msra.mxu0 %v1610_v57 }
 0x20c   :  { %1505 = vmatprep.subr.bf16.mxu0 %v1611_v58 }
 0x20f   :  { %1506 = vmatpush3.bf16.msra.mxu0 %v1611_v58 }
 0x210   :  { %1507 = vmatprep.subr.bf16.mxu0 %v1612_v59 }
 0x212   :  { %1460 = vmatmul.mubr.bf16.gmra.mrb[20].mxu0 %v1597_v51 }
 0x213   :  { %1463 = vmatprep.mubr.bf16.mxu0 %v1598_v52  ;;  %1508 = vmatpush3.bf16.msra.mxu0 %v1612_v59 }
 0x214   :  { %1509 = vmatprep.subr.bf16.mxu0 %v1613_v60 }
 0x217   :  { %1510 = vmatpush3.bf16.msra.mxu0 %v1613_v60 }
 0x218   :  { %1511 = vmatprep.subr.bf16.mxu0 %v1614_v61 }
 0x21a   :  { %1464 = vmatmul.mubr.bf16.gmra.mrb[24].mxu0 %v1599_v53 }
 0x21b   :  { %1467 = vmatprep.mubr.bf16.mxu0 %v1600_v54  ;;  %1512 = vmatpush3.bf16.msra.mxu0 %v1614_v61 }
 0x21c   :  { %1513 = vmatprep.subr.bf16.mxu0 %v1615_v62 }
 0x21f   :  { %1514 = vmatpush3.bf16.msra.mxu0 %v1615_v62 }
 0x220   :  { %1515 = vmatprep.subr.bf16.mxu0 %v1616_v23 }
 0x222   :  { %1468 = vmatmul.mubr.bf16.gmra.mrb[28].mxu0 %v1601_v55 }
 0x223   :  { %1516 = vmatpush3.bf16.msra.mxu0 %v1616_v23 }
 0x224   :  { %1517 = vmatprep.subr.bf16.mxu0 %v1617_v24 }
 0x227   :  { %1518 = vmatpush3.bf16.msra.mxu0 %v1617_v24 }
 0x2dd   :  { %v1457_v63 = vpop.f32.mrb[16].mxu0 }
 0x2de   :  { %v600_v0 = vpop.f32.mrb[17].mxu0 }
 0x2df   :  { %v1458_v1 = vpop.f32.mrb[18].mxu0 }
 0x2e0   :  { %v664_v2 = vpack.c.bf16 %v1458_v1, %v1457_v63  ;;  %v603_v3 = vpop.f32.mrb[19].mxu0 }
 0x2e1   :  { %v663_v4 = vpack.c.bf16 %v603_v3, %v600_v0 }
 0x2e3   :  { %1487 = vmatprep.mubr.bf16.mxu1 %v663_v4 }
 0x2e4   :  { %1488 = vmatmul.mubr.bf16.vlgmr.msra.gmra.mrb[16].mxu1 %v664_v2 }
 0x2e5   :  { %v1461_v5 = vpop.f32.mrb[20].mxu0 }
 0x2e6   :  { %v616_v6 = vpop.f32.mrb[21].mxu0 }
 0x2e7   :  { %v1462_v7 = vpop.f32.mrb[22].mxu0 }
 0x2e8   :  { %v666_v8 = vpack.c.bf16 %v1462_v7, %v1461_v5  ;;  %v619_v9 = vpop.f32.mrb[23].mxu0 }
 0x2e9   :  { %v665_v10 = vpack.c.bf16 %v619_v9, %v616_v6 }
 0x2eb   :  { %1491 = vmatprep.mubr.bf16.mxu1 %v665_v10 }
 0x2ec   :  { %1492 = vmatmul.mubr.bf16.gmra.mrb[20].mxu1 %v666_v8 }
 0x2ed   :  { %v1465_v11 = vpop.f32.mrb[24].mxu0 }
 0x2ee   :  { %v632_v12 = vpop.f32.mrb[25].mxu0 }
 0x2ef   :  { %v1466_v13 = vpop.f32.mrb[26].mxu0 }
 0x2f0   :  { %v668_v14 = vpack.c.bf16 %v1466_v13, %v1465_v11  ;;  %v635_v15 = vpop.f32.mrb[27].mxu0 }
 0x2f1   :  { %v667_v16 = vpack.c.bf16 %v635_v15, %v632_v12 }
 0x2f3   :  { %1495 = vmatprep.mubr.bf16.mxu1 %v667_v16 }
 0x2f4   :  { %1496 = vmatmul.mubr.bf16.gmra.mrb[24].mxu1 %v668_v14 }
 0x2f5   :  { %v1469_v17 = vpop.f32.mrb[28].mxu0 }
 0x2f6   :  { %v648_v18 = vpop.f32.mrb[29].mxu0 }
 0x2f7   :  { %v1470_v19 = vpop.f32.mrb[30].mxu0 }
 0x2f8   :  { %v670_v20 = vpack.c.bf16 %v1470_v19, %v1469_v17  ;;  %v651_v21 = vpop.f32.mrb[31].mxu0 }
 0x2f9   :  { %v669_v22 = vpack.c.bf16 %v651_v21, %v648_v18  ;;  %v1618_v18 = vld [vmem:[#allocation3] sm:$0xff]  }
 0x2fb   :  { %1499 = vmatprep.mubr.bf16.mxu1 %v669_v22 }
 0x2fc   :  { %1500 = vmatmul.mubr.bf16.gmra.mrb[28].mxu1 %v670_v20 }
 0x2fd   :  { %1551 = vmatprep.mubr.bf16.mxu1 %v1618_v18 }
 0x3b7   :  { %v1489_v26 = vpop.f32.mrb[16].mxu1 }
 0x3b8   :  { %v768_v27 = vadd.f32 %v1489_v26, %v1253_v25  ;;  %v759_v28 = vpop.f32.mrb[17].mxu1 }
 0x3b9   :  { %v760_v29 = vadd.f32 %v1253_v25, %v759_v28  ;;  %v1490_v30 = vpop.f32.mrb[18].mxu1 }
 0x3ba   :  { %v771_v31 = vadd.f32 %v1490_v30, %v1253_v25  ;;  %v762_v32 = vpop.f32.mrb[19].mxu1  ;;  %v824_v34 = vmax.f32 %v768_v27, 0.0 }
 0x3bb   :  { %v763_v33 = vadd.f32 %v1253_v25, %v762_v32  ;;  %v822_v36 = vmax.f32 %v760_v29, 0.0 }
 0x3bc   :  { %v825_v35 = vmax.f32 %v771_v31, 0.0 }
 0x3bd   :  { %v823_v37 = vmax.f32 %v763_v33, 0.0 }
 0x3be   :  { %v839_v38 = vpack.c.bf16 %v825_v35, %v824_v34 }
 0x3bf   :  { %v838_v39 = vpack.c.bf16 %v823_v37, %v822_v36  ;;  %v1493_v40 = vpop.f32.mrb[20].mxu1 }
 0x3c0   :  { %v784_v41 = vadd.f32 %v1493_v40, %v1253_v25  ;;  %v775_v42 = vpop.f32.mrb[21].mxu1 }
 0x3c1   :  { %v776_v43 = vadd.f32 %v1253_v25, %v775_v42  ;;  %v1494_v44 = vpop.f32.mrb[22].mxu1  ;;  %1519 = vmatprep.mubr.bf16.mxu0 %v838_v39 }
 0x3c2   :  { %v787_v45 = vadd.f32 %v1494_v44, %v1253_v25  ;;  %v778_v46 = vpop.f32.mrb[23].mxu1  ;;  %1520 = vmatmul.mubr.bf16.vlgmr.msra.gmra.mrb[32].mxu0 %v839_v38  ;;  %v828_v48 = vmax.f32 %v784_v41, 0.0  ;;  %v1620_v44 = vld [vmem:[#allocation3 + $0x10] sm:$0xff]  }
 0x3c3   :  { %v779_v47 = vadd.f32 %v1253_v25, %v778_v46  ;;  %v826_v50 = vmax.f32 %v776_v43, 0.0  ;;  %v1619_v43 = vld [vmem:[#allocation3 + $0x8] sm:$0xff]   ;;  %v1622_v46 = vld [vmem:[#allocation3 + $0x20] sm:$0xff]  }
 0x3c4   :  { %v829_v49 = vmax.f32 %v787_v45, 0.0  ;;  %v1621_v45 = vld [vmem:[#allocation3 + $0x18] sm:$0xff]  }
 0x3c5   :  { %v827_v51 = vmax.f32 %v779_v47, 0.0  ;;  %v1623_v47 = vld [vmem:[#allocation3 + $0x28] sm:$0xff]  }
 0x3c6   :  { %v841_v52 = vpack.c.bf16 %v829_v49, %v828_v48  ;;  %v1624_v48 = vld [vmem:[#allocation3 + $0x30] sm:$0xff]   ;;  %v1625_v49 = vld [vmem:[#allocation3 + $0x38] sm:$0xff]  }
 0x3c7   :  { %v840_v53 = vpack.c.bf16 %v827_v51, %v826_v50  ;;  %v1497_v54 = vpop.f32.mrb[24].mxu1  ;;  %v1270_v50 = vld [vmem:[%s1870_s7] ss:$0 sm:$0xff] }
 0x3c8   :  { %v800_v55 = vadd.f32 %v1497_v54, %v1253_v25  ;;  %v791_v56 = vpop.f32.mrb[25].mxu1 }
 0x3c9   :  { %v792_v57 = vadd.f32 %v1253_v25, %v791_v56  ;;  %v1498_v58 = vpop.f32.mrb[26].mxu1  ;;  %1523 = vmatprep.mubr.bf16.mxu0 %v840_v53 }
 0x3ca   :  { %v803_v59 = vadd.f32 %v1498_v58, %v1253_v25  ;;  %v794_v60 = vpop.f32.mrb[27].mxu1  ;;  %1524 = vmatmul.mubr.bf16.gmra.mrb[36].mxu0 %v841_v52  ;;  %v832_v62 = vmax.f32 %v800_v55, 0.0 }
 0x3cb   :  { %v795_v61 = vadd.f32 %v1253_v25, %v794_v60  ;;  %v830_v0 = vmax.f32 %v792_v57, 0.0 }
 0x3cc   :  { %v833_v63 = vmax.f32 %v803_v59, 0.0 }
 0x3cd   :  { %v831_v1 = vmax.f32 %v795_v61, 0.0 }
 0x3ce   :  { %v843_v2 = vpack.c.bf16 %v833_v63, %v832_v62 }
 0x3cf   :  { %v842_v3 = vpack.c.bf16 %v831_v1, %v830_v0  ;;  %v1501_v4 = vpop.f32.mrb[28].mxu1 }
 0x3d0   :  { %v816_v5 = vadd.f32 %v1501_v4, %v1253_v25  ;;  %v807_v6 = vpop.f32.mrb[29].mxu1 }
 0x3d1   :  { %v808_v7 = vadd.f32 %v1253_v25, %v807_v6  ;;  %v1502_v8 = vpop.f32.mrb[30].mxu1  ;;  %1527 = vmatprep.mubr.bf16.mxu0 %v842_v3 }
 0x3d2   :  { %v819_v9 = vadd.f32 %v1502_v8, %v1253_v25  ;;  %v810_v10 = vpop.f32.mrb[31].mxu1  ;;  %1528 = vmatmul.mubr.bf16.gmra.mrb[40].mxu0 %v843_v2  ;;  %v836_v12 = vmax.f32 %v816_v5, 0.0 }
 0x3d3   :  { %v811_v11 = vadd.f32 %v1253_v25, %v810_v10  ;;  %v834_v14 = vmax.f32 %v808_v7, 0.0 }
 0x3d4   :  { %v837_v13 = vmax.f32 %v819_v9, 0.0 }
 0x3d5   :  { %v835_v15 = vmax.f32 %v811_v11, 0.0 }
 0x3d6   :  { %v845_v16 = vpack.c.bf16 %v837_v13, %v836_v12 }
 0x3d7   :  { %v844_v17 = vpack.c.bf16 %v835_v15, %v834_v14 }
 0x3d9   :  { %1531 = vmatprep.mubr.bf16.mxu0 %v844_v17 }
 0x3da   :  { %1532 = vmatmul.mubr.bf16.gmra.mrb[44].mxu0 %v845_v16 }
 0x495   :  { %v1521_v19 = vpop.f32.mrb[32].mxu0 }
 0x496   :  { %v977_v20 = vpop.f32.mrb[33].mxu0 }
 0x497   :  { %v1522_v21 = vpop.f32.mrb[34].mxu0 }
 0x498   :  { %v1041_v22 = vpack.c.bf16 %v1522_v21, %v1521_v19  ;;  %v980_v23 = vpop.f32.mrb[35].mxu0 }
 0x499   :  { %v1040_v24 = vpack.c.bf16 %v980_v23, %v977_v20 }
 0x49b   :  { %1535 = vmatprep.subr.bf16.mxu1 %v1040_v24 }
 0x49c   :  { %1536 = vmatpush3.bf16.msra.mxu1 %v1040_v24 }
 0x49d   :  { %v1525_v26 = vpop.f32.mrb[36].mxu0  ;;  %1537 = vmatprep.subr.bf16.mxu1 %v1041_v22 }
 0x49e   :  { %v993_v25 = vpop.f32.mrb[37].mxu0 }
 0x49f   :  { %v1526_v27 = vpop.f32.mrb[38].mxu0 }
 0x4a0   :  { %v1043_v28 = vpack.c.bf16 %v1526_v27, %v1525_v26  ;;  %v996_v29 = vpop.f32.mrb[39].mxu0  ;;  %1538 = vmatpush3.bf16.msra.mxu1 %v1041_v22 }
 0x4a1   :  { %v1042_v30 = vpack.c.bf16 %v996_v29, %v993_v25 }
 0x4a3   :  { %1539 = vmatprep.subr.bf16.mxu1 %v1042_v30 }
 0x4a4   :  { %1540 = vmatpush3.bf16.msra.mxu1 %v1042_v30 }
 0x4a5   :  { %v1529_v31 = vpop.f32.mrb[40].mxu0  ;;  %1541 = vmatprep.subr.bf16.mxu1 %v1043_v28 }
 0x4a6   :  { %v1009_v32 = vpop.f32.mrb[41].mxu0 }
 0x4a7   :  { %v1530_v33 = vpop.f32.mrb[42].mxu0 }
 0x4a8   :  { %v1045_v34 = vpack.c.bf16 %v1530_v33, %v1529_v31  ;;  %v1012_v35 = vpop.f32.mrb[43].mxu0  ;;  %1542 = vmatpush3.bf16.msra.mxu1 %v1043_v28 }
 0x4a9   :  { %v1044_v36 = vpack.c.bf16 %v1012_v35, %v1009_v32 }
 0x4ab   :  { %1543 = vmatprep.subr.bf16.mxu1 %v1044_v36 }
 0x4ac   :  { %1544 = vmatpush3.bf16.msra.mxu1 %v1044_v36 }
 0x4ad   :  { %v1533_v37 = vpop.f32.mrb[44].mxu0  ;;  %1545 = vmatprep.subr.bf16.mxu1 %v1045_v34 }
 0x4ae   :  { %v1025_v38 = vpop.f32.mrb[45].mxu0 }
 0x4af   :  { %v1534_v39 = vpop.f32.mrb[46].mxu0 }
 0x4b0   :  { %v1047_v40 = vpack.c.bf16 %v1534_v39, %v1533_v37  ;;  %v1028_v41 = vpop.f32.mrb[47].mxu0  ;;  %1546 = vmatpush3.bf16.msra.mxu1 %v1045_v34 }
 0x4b1   :  { %v1046_v42 = vpack.c.bf16 %v1028_v41, %v1025_v38 }
 0x4b3   :  { %1547 = vmatprep.subr.bf16.mxu1 %v1046_v42 }
 0x4b4   :  { %1548 = vmatpush3.bf16.msra.mxu1 %v1046_v42 }
 0x4b5   :  { %1549 = vmatprep.subr.bf16.mxu1 %v1047_v40 }
 0x4b8   :  { %1550 = vmatpush3.bf16.msra.mxu1 %v1047_v40 }
 0x4bb   :  { %1552 = vmatmul.mubr.bf16.vlgmr.msra.gmra.mrb[32].mxu1 %v1619_v43 }
 0x4bc   :  { %1555 = vmatprep.mubr.bf16.mxu1 %v1620_v44 }
 0x4c3   :  { %1556 = vmatmul.mubr.bf16.gmra.mrb[36].mxu1 %v1621_v45 }
 0x4c4   :  { %1559 = vmatprep.mubr.bf16.mxu1 %v1622_v46 }
 0x4cb   :  { %1560 = vmatmul.mubr.bf16.gmra.mrb[40].mxu1 %v1623_v47 }
 0x4cc   :  { %1563 = vmatprep.mubr.bf16.mxu1 %v1624_v48 }
 0x4d3   :  { %1564 = vmatmul.mubr.bf16.gmra.mrb[44].mxu1 %v1625_v49 }
 0x58e   :  { %v1553_v51 = vpop.f32.mrb[32].mxu1 }
 0x58f   :  { %v1145_v52 = vadd.f32 %v1553_v51, %v1270_v50  ;;  %v1136_v53 = vpop.f32.mrb[33].mxu1 }
 0x590   :  { %v1137_v54 = vadd.f32 %v1270_v50, %v1136_v53  ;;  %v1554_v55 = vpop.f32.mrb[34].mxu1 }
 0x591   :  { %1201 = vst [vmem:[%s1871_s8 + $0x10] sm:$0xff] %v1145_v52  ;;  %v1148_v56 = vadd.f32 %v1554_v55, %v1270_v50  ;;  %v1139_v57 = vpop.f32.mrb[35].mxu1 }
 0x592   :  { %1199 = vst [vmem:[%s1871_s8] sm:$0xff] %v1137_v54  ;;  %v1140_v58 = vadd.f32 %v1270_v50, %v1139_v57 }
 0x593   :  { %1202 = vst [vmem:[%s1871_s8 + $0x18] sm:$0xff] %v1148_v56 }
 0x594   :  { %1200 = vst [vmem:[%s1871_s8 + $0x8] sm:$0xff] %v1140_v58 }
 0x596   :  { %v1557_v59 = vpop.f32.mrb[36].mxu1 }
 0x597   :  { %v1161_v60 = vadd.f32 %v1557_v59, %v1270_v50  ;;  %v1152_v61 = vpop.f32.mrb[37].mxu1 }
 0x598   :  { %v1153_v62 = vadd.f32 %v1270_v50, %v1152_v61  ;;  %v1558_v63 = vpop.f32.mrb[38].mxu1 }
 0x599   :  { %1205 = vst [vmem:[%s1871_s8 + $0x30] sm:$0xff] %v1161_v60  ;;  %v1164_v0 = vadd.f32 %v1558_v63, %v1270_v50  ;;  %v1155_v1 = vpop.f32.mrb[39].mxu1 }
 0x59a   :  { %1203 = vst [vmem:[%s1871_s8 + $0x20] sm:$0xff] %v1153_v62  ;;  %v1156_v2 = vadd.f32 %v1270_v50, %v1155_v1 }
 0x59b   :  { %1206 = vst [vmem:[%s1871_s8 + $0x38] sm:$0xff] %v1164_v0 }
 0x59c   :  { %1204 = vst [vmem:[%s1871_s8 + $0x28] sm:$0xff] %v1156_v2 }
 0x59e   :  { %v1561_v3 = vpop.f32.mrb[40].mxu1 }
 0x59f   :  { %v1177_v4 = vadd.f32 %v1561_v3, %v1270_v50  ;;  %v1168_v5 = vpop.f32.mrb[41].mxu1 }
 0x5a0   :  { %v1169_v6 = vadd.f32 %v1270_v50, %v1168_v5  ;;  %v1562_v7 = vpop.f32.mrb[42].mxu1 }
 0x5a1   :  { %1209 = vst [vmem:[%s1871_s8 + $0x50] sm:$0xff] %v1177_v4  ;;  %v1180_v8 = vadd.f32 %v1562_v7, %v1270_v50  ;;  %v1171_v9 = vpop.f32.mrb[43].mxu1 }
 0x5a2   :  { %1207 = vst [vmem:[%s1871_s8 + $0x40] sm:$0xff] %v1169_v6  ;;  %v1172_v10 = vadd.f32 %v1270_v50, %v1171_v9 }
 0x5a3   :  { %1210 = vst [vmem:[%s1871_s8 + $0x58] sm:$0xff] %v1180_v8 }
 0x5a4   :  { %1208 = vst [vmem:[%s1871_s8 + $0x48] sm:$0xff] %v1172_v10 }
 0x5a6   :  { %v1565_v11 = vpop.f32.mrb[44].mxu1 }
 0x5a7   :  { %v1193_v12 = vadd.f32 %v1565_v11, %v1270_v50  ;;  %v1184_v13 = vpop.f32.mrb[45].mxu1 }
 0x5a8   :  { %v1185_v14 = vadd.f32 %v1270_v50, %v1184_v13  ;;  %v1566_v15 = vpop.f32.mrb[46].mxu1 }
 0x5a9   :  { %1213 = vst [vmem:[%s1871_s8 + $0x70] sm:$0xff] %v1193_v12  ;;  %v1196_v16 = vadd.f32 %v1566_v15, %v1270_v50  ;;  %v1187_v17 = vpop.f32.mrb[47].mxu1 }
 0x5aa   :  { %1211 = vst [vmem:[%s1871_s8 + $0x60] sm:$0xff] %v1185_v14  ;;  %v1188_v18 = vadd.f32 %v1270_v50, %v1187_v17 }
 0x5ab   :  { %1214 = vst [vmem:[%s1871_s8 + $0x78] sm:$0xff] %v1196_v16 }
 0x5ac   :  { %1212 = vst [vmem:[%s1871_s8 + $0x68] sm:$0xff] %v1188_v18 }
 0x5ad   :  { %1219 = vsyncpa [#allocation4], 1 }

</bundles_post_ra>
